<compile_context>
chip_gen: v6e
topology: v6e:2x2x1
jax: 0.10.0
libtpu: 0.0.40
codegen_flags: <defaults>
</compile_context>

<pallas_src>
import jax
import jax.numpy as jnp
from jax import lax
from jax.experimental import pallas as pl
from jax.experimental.pallas import tpu as pltpu

BN_EPS = 1e-5
LEAKY_SLOPE = 0.01              # PyTorch nn.LeakyReLU() default
VMEM_LIMIT = 32 * 1024 * 1024   # explicit scoped-VMEM budget (safe on v5e/v6e/v7x)


# ----------------------------------------------------------------------------
# Pass 1: conv tile (MXU) -> y (bf16) + per-image per-channel sum / sum-of-squares.
# ----------------------------------------------------------------------------
def _conv_stats_kernel(p_ref, w_ref, y_ref, sum_ref, sq_ref):
    # p_ref: (K, TP) bf16   w_ref: (C_out, K) bf16   y_ref: (C_out, TP) bf16
    # sum_ref/sq_ref: (C_out, 1) f32, VMEM-resident across the position axis.
    @pl.when(pl.program_id(1) == 0)
    def _():
        sum_ref[...] = jnp.zeros_like(sum_ref)
        sq_ref[...] = jnp.zeros_like(sq_ref)

    y = jnp.dot(w_ref[...], p_ref[...], preferred_element_type=jnp.float32)
    y_ref[...] = y.astype(y_ref.dtype)
    sum_ref[...] += jnp.sum(y, axis=1, keepdims=True)
    sq_ref[...] += jnp.sum(y * y, axis=1, keepdims=True)


# ----------------------------------------------------------------------------
# Pass 2: matmul-free folded BN scale/shift + LeakyReLU on the stored conv result.
# ----------------------------------------------------------------------------
def _bn_lrelu_kernel(y_ref, scale_ref, shift_ref, o_ref):
    # y_ref: (C_out, TP) bf16   scale/shift: (C_out, 1) f32   o_ref: (C_out, TP) f32
    y = y_ref[...].astype(jnp.float32) * scale_ref[...] + shift_ref[...]
    o_ref[...] = jnp.where(y >= 0, y, LEAKY_SLOPE * y)


def _pick_tile_p(ohw, k, c_out):
    """Largest position tile (lane dim) that divides OH*OW and stays in VMEM budget."""
    if ohw % 128 == 0:
        bytes_per_pos = 2 * k + 2 * c_out + 4 * c_out   # patches + y(bf16) + out(f32)
        cap = max(128, (8 * 1024 * 1024) // bytes_per_pos // 128 * 128)
        tile_p = min(ohw, cap)
        while ohw % tile_p != 0:
            tile_p -= 128
        return tile_p
    # Ragged OH*OW: cover the full dim in one block (exempt from the 128-lane rule).
    # TODO(synk): pad/tile the position axis for very large non-128-multiple OH*OW.
    return ohw


@jax.jit
def encoder_layer_forward(x, conv_w, conv_b, bn_gamma, bn_beta):
    """x: (N, C_in, H, W) f32 NCHW.  Returns (N, C_out, H//2, W//2) f32 NCHW."""
    del conv_b  # exactly cancelled by training-mode BN: (y+b)-mean(y+b) == y-mean(y)

    n, c_in, h, w = x.shape
    c_out = conv_w.shape[0]
    oh = (h + 2 - 4) // 2 + 1
    ow = (w + 2 - 4) // 2 + 1
    ohw = oh * ow
    k = c_in * 4 * 4

    # Patches in (N, K, OH*OW) layout, bf16, via a single fused XLA op whose feature
    # order (c_in-major, then kh, kw) matches PyTorch's (C_out, C_in*KH*KW) flatten.
    x_bf = x.astype(jnp.bfloat16)
    patches = lax.conv_general_dilated_patches(
        x_bf, filter_shape=(4, 4), window_strides=(2, 2),
        padding=((1, 1), (1, 1)),
        dimension_numbers=("NCHW", "OIHW", "NCHW"))        # (N, K, OH, OW)
    patches = patches.reshape(n, k, ohw)                   # free view
    w2 = conv_w.reshape(c_out, k).astype(jnp.bfloat16)     # (C_out, K)

    tile_p = _pick_tile_p(ohw, k, c_out)
    num_t = ohw // tile_p

    # -------- pass 1: conv + exact cross-tile batch statistics --------
    y_conv, ch_sum, ch_sq = pl.pallas_call(
        _conv_stats_kernel,
        out_shape=(jax.ShapeDtypeStruct((n, c_out, ohw), jnp.bfloat16),
                   jax.ShapeDtypeStruct((n, c_out, 1), jnp.float32),
                   jax.ShapeDtypeStruct((n, c_out, 1), jnp.float32)),
        grid=(n, num_t),
        in_specs=[pl.BlockSpec((None, k, tile_p), lambda i, t: (i, 0, t)),
                  pl.BlockSpec((c_out, k), lambda i, t: (0, 0))],
        out_specs=(pl.BlockSpec((None, c_out, tile_p), lambda i, t: (i, 0, t)),
                   pl.BlockSpec((None, c_out, 1), lambda i, t: (i, 0, 0)),
                   pl.BlockSpec((None, c_out, 1), lambda i, t: (i, 0, 0))),
        compiler_params=pltpu.CompilerParams(
            dimension_semantics=("parallel", "arbitrary"),  # N shards across TCs (v7x)
            vmem_limit_bytes=VMEM_LIMIT),
    )(patches, w2)

    # Fold BN into a per-channel scale/shift (tiny; plain XLA on (C_out,1) vectors).
    m_f = jnp.float32(n * ohw)
    mean = jnp.sum(ch_sum, axis=0) / m_f                        # (C_out, 1)
    var = jnp.maximum(jnp.sum(ch_sq, axis=0) / m_f - mean * mean, 0.0)
    inv_std = lax.rsqrt(var + BN_EPS)
    scale = bn_gamma.astype(jnp.float32).reshape(c_out, 1) * inv_std
    shift = bn_beta.astype(jnp.float32).reshape(c_out, 1) - mean * scale

    # -------- pass 2: normalize + LeakyReLU; output is already flat NCHW --------
    out_flat = pl.pallas_call(
        _bn_lrelu_kernel,
        out_shape=jax.ShapeDtypeStruct((n, c_out, ohw), jnp.float32),
        grid=(n, num_t),
        in_specs=[pl.BlockSpec((None, c_out, tile_p), lambda i, t: (i, 0, t)),
                  pl.BlockSpec((c_out, 1), lambda i, t: (0, 0)),
                  pl.BlockSpec((c_out, 1), lambda i, t: (0, 0))],
        out_specs=pl.BlockSpec((None, c_out, tile_p), lambda i, t: (i, 0, t)),
        compiler_params=pltpu.CompilerParams(
            dimension_semantics=("parallel", "parallel"),
            vmem_limit_bytes=VMEM_LIMIT),
    )(y_conv, scale, shift)

    return out_flat.reshape(n, c_out, oh, ow)   # free view, already NCHW


# ---------------------------- reference (f32, HIGHEST) ----------------------------
def _reference_forward(x, conv_w, conv_b, bn_gamma, bn_beta):
    y = lax.conv_general_dilated(
        x, conv_w, window_strides=(2, 2), padding=((1, 1), (1, 1)),
        dimension_numbers=("NCHW", "OIHW", "NCHW"),
        precision=lax.Precision.HIGHEST,
    ) + conv_b.reshape(1, -1, 1, 1)
    mean = jnp.mean(y, axis=(0, 2, 3), keepdims=True)
    var = jnp.mean((y - mean) ** 2, axis=(0, 2, 3), keepdims=True)
    yh = (y - mean) * lax.rsqrt(var + BN_EPS)
    yh = yh * bn_gamma.reshape(1, -1, 1, 1) + bn_beta.reshape(1, -1, 1, 1)
    return jnp.where(yh >= 0, yh, LEAKY_SLOPE * yh)


if __name__ == "__main__":
    key = jax.random.PRNGKey(0)
    k_x, k_w, k_b = jax.random.split(key, 3)

    N, C_IN, C_OUT, H, W = 2, 4, 8, 16, 16
    x = jax.random.normal(k_x, (N, C_IN, H, W), dtype=jnp.float32)

    # Deterministic synthetic params (fresh nn.BatchNorm2d affine = (1, 0)).
    fan_in = C_IN * 4 * 4
    conv_w = jax.random.uniform(k_w, (C_OUT, C_IN, 4, 4), jnp.float32,
                                minval=-1.0, maxval=1.0) / jnp.sqrt(fan_in)
    conv_b = jax.random.uniform(k_b, (C_OUT,), jnp.float32,
                                minval=-1.0, maxval=1.0) / jnp.sqrt(fan_in)
    bn_gamma = jnp.ones((C_OUT,), jnp.float32)
    bn_beta = jnp.zeros((C_OUT,), jnp.float32)

    out = encoder_layer_forward(x, conv_w, conv_b, bn_gamma, bn_beta)
    out = jax.block_until_ready(out)

    ref = _reference_forward(x, conv_w, conv_b, bn_gamma, bn_beta)
    assert out.shape == (N, C_OUT, H // 2, W // 2), out.shape
    # Tolerance sized for bf16 patches/weights (+ bf16 conv-result storage) with f32
    # accumulation, compared against an f32 HIGHEST-precision reference.
    max_err = float(jnp.max(jnp.abs(out - ref)))
    assert jnp.allclose(out, ref, atol=3e-2, rtol=2e-2), max_err

    print("KERNEL_OK")
</pallas_src>

<mosaic_0001>
module attributes {stable_mosaic.version = 11 : i64} {
  func.func @_conv_stats_kernel(%arg0: i32, %arg1: i32, %arg2: memref<1x64x64xbf16, #tpu.memory_space<vmem>>, %arg3: memref<8x64xbf16, #tpu.memory_space<vmem>>, %arg4: memref<1x8x64xbf16, #tpu.memory_space<vmem>>, %arg5: memref<1x8x1xf32, #tpu.memory_space<vmem>>, %arg6: memref<1x8x1xf32, #tpu.memory_space<vmem>>) attributes {dimension_semantics = [#tpu.dimension_semantics<parallel>, #tpu.dimension_semantics<arbitrary>], iteration_bounds = array<i64: 2, 1>, scalar_prefetch = 0 : i64, scratch_operands = 0 : i64, tpu.core_type = #tpu.core_type<tc>, window_params = [{transform_indices = @transform_0, window_bounds = array<i64: 1, 64, 64>}, {pipeline_mode = #tpu.pipeline_mode<synchronous>, transform_indices = @transform_1, window_bounds = array<i64: 8, 64>}, {transform_indices = @transform_2, window_bounds = array<i64: 1, 8, 64>}, {transform_indices = @transform_3, window_bounds = array<i64: 1, 8, 1>}, {transform_indices = @transform_4, window_bounds = array<i64: 1, 8, 1>}]} {
    %c0_i32 = arith.constant 0 : i32
    %0 = arith.cmpi eq, %arg1, %c0_i32 : i32
    %1 = arith.extui %0 : i1 to i32
    %c0_i32_0 = arith.constant 0 : i32
    %2 = arith.cmpi ne, %1, %c0_i32_0 : i32
    scf.if %2 {
      %cst_22 = arith.constant 0.000000e+00 : f32
      %28 = vector.broadcast %cst_22 : f32 to vector<8x1xf32>
      %c0_23 = arith.constant 0 : index
      %c0_24 = arith.constant 0 : index
      %c0_25 = arith.constant 0 : index
      %29 = vector.load %arg5[%c0_23, %c0_24, %c0_25] : memref<1x8x1xf32, #tpu.memory_space<vmem>>, vector<1x8x1xf32>
      %30 = vector.shape_cast %29 : vector<1x8x1xf32> to vector<8x1xf32>
      %31 = vector.shape_cast %28 : vector<8x1xf32> to vector<1x8x1xf32>
      tpu.vector_store %arg5[%c0_23, %c0_24, %c0_25], %31 {strides = array<i32>} : memref<1x8x1xf32, #tpu.memory_space<vmem>>, vector<1x8x1xf32>,
      %cst_26 = arith.constant 0.000000e+00 : f32
      %32 = vector.broadcast %cst_26 : f32 to vector<8x1xf32>
      %c0_27 = arith.constant 0 : index
      %c0_28 = arith.constant 0 : index
      %c0_29 = arith.constant 0 : index
      %33 = vector.load %arg6[%c0_27, %c0_28, %c0_29] : memref<1x8x1xf32, #tpu.memory_space<vmem>>, vector<1x8x1xf32>
      %34 = vector.shape_cast %33 : vector<1x8x1xf32> to vector<8x1xf32>
      %35 = vector.shape_cast %32 : vector<8x1xf32> to vector<1x8x1xf32>
      tpu.vector_store %arg6[%c0_27, %c0_28, %c0_29], %35 {strides = array<i32>} : memref<1x8x1xf32, #tpu.memory_space<vmem>>, vector<1x8x1xf32>,
    } else {
    }
    %c0 = arith.constant 0 : index
    %c0_1 = arith.constant 0 : index
    %3 = vector.load %arg3[%c0, %c0_1] : memref<8x64xbf16, #tpu.memory_space<vmem>>, vector<8x64xbf16>
    %c0_2 = arith.constant 0 : index
    %c0_3 = arith.constant 0 : index
    %c0_4 = arith.constant 0 : index
    %4 = vector.load %arg2[%c0_2, %c0_3, %c0_4] : memref<1x64x64xbf16, #tpu.memory_space<vmem>>, vector<1x64x64xbf16>
    %5 = vector.shape_cast %4 : vector<1x64x64xbf16> to vector<64x64xbf16>
    %cst = arith.constant dense<0.000000e+00> : vector<8x64xf32>
    %6 = tpu.matmul %3, %5, %cst {dimension_numbers = #tpu.dot_dimension_numbers<[1], [0], [0], [1], [0, 0, 1, 1], [], []>} : vector<8x64xbf16>, vector<64x64xbf16>, vector<8x64xf32> -> vector<8x64xf32>
    %7 = arith.truncf %6 : vector<8x64xf32> to vector<8x64xbf16>
    %c0_5 = arith.constant 0 : index
    %c0_6 = arith.constant 0 : index
    %c0_7 = arith.constant 0 : index
    %8 = vector.load %arg4[%c0_5, %c0_6, %c0_7] : memref<1x8x64xbf16, #tpu.memory_space<vmem>>, vector<1x8x64xbf16>
    %9 = vector.shape_cast %8 : vector<1x8x64xbf16> to vector<8x64xbf16>
    %10 = vector.shape_cast %7 : vector<8x64xbf16> to vector<1x8x64xbf16>
    tpu.vector_store %arg4[%c0_5, %c0_6, %c0_7], %10 {strides = array<i32>} : memref<1x8x64xbf16, #tpu.memory_space<vmem>>, vector<1x8x64xbf16>,
    %c0_8 = arith.constant 0 : index
    %c0_9 = arith.constant 0 : index
    %c0_10 = arith.constant 0 : index
    %11 = vector.load %arg5[%c0_8, %c0_9, %c0_10] : memref<1x8x1xf32, #tpu.memory_space<vmem>>, vector<1x8x1xf32>
    %12 = vector.shape_cast %11 : vector<1x8x1xf32> to vector<8x1xf32>
    %cst_11 = arith.constant dense<0.000000e+00> : vector<8xf32>
    %13 = vector.multi_reduction <add>, %6, %cst_11 [1] : vector<8x64xf32> to vector<8xf32>
    %14 = vector.shape_cast %13 : vector<8xf32> to vector<8x1xf32>
    %15 = arith.addf %12, %14 : vector<8x1xf32>
    %c0_12 = arith.constant 0 : index
    %c0_13 = arith.constant 0 : index
    %c0_14 = arith.constant 0 : index
    %16 = vector.load %arg5[%c0_12, %c0_13, %c0_14] : memref<1x8x1xf32, #tpu.memory_space<vmem>>, vector<1x8x1xf32>
    %17 = vector.shape_cast %16 : vector<1x8x1xf32> to vector<8x1xf32>
    %18 = vector.shape_cast %15 : vector<8x1xf32> to vector<1x8x1xf32>
    tpu.vector_store %arg5[%c0_12, %c0_13, %c0_14], %18 {strides = array<i32>} : memref<1x8x1xf32, #tpu.memory_space<vmem>>, vector<1x8x1xf32>,
    %c0_15 = arith.constant 0 : index
    %c0_16 = arith.constant 0 : index
    %c0_17 = arith.constant 0 : index
    %19 = vector.load %arg6[%c0_15, %c0_16, %c0_17] : memref<1x8x1xf32, #tpu.memory_space<vmem>>, vector<1x8x1xf32>
    %20 = vector.shape_cast %19 : vector<1x8x1xf32> to vector<8x1xf32>
    %21 = arith.mulf %6, %6 : vector<8x64xf32>
    %cst_18 = arith.constant dense<0.000000e+00> : vector<8xf32>
    %22 = vector.multi_reduction <add>, %21, %cst_18 [1] : vector<8x64xf32> to vector<8xf32>
    %23 = vector.shape_cast %22 : vector<8xf32> to vector<8x1xf32>
    %24 = arith.addf %20, %23 : vector<8x1xf32>
    %c0_19 = arith.constant 0 : index
    %c0_20 = arith.constant 0 : index
    %c0_21 = arith.constant 0 : index
    %25 = vector.load %arg6[%c0_19, %c0_20, %c0_21] : memref<1x8x1xf32, #tpu.memory_space<vmem>>, vector<1x8x1xf32>
    %26 = vector.shape_cast %25 : vector<1x8x1xf32> to vector<8x1xf32>
    %27 = vector.shape_cast %24 : vector<8x1xf32> to vector<1x8x1xf32>
    tpu.vector_store %arg6[%c0_19, %c0_20, %c0_21], %27 {strides = array<i32>} : memref<1x8x1xf32, #tpu.memory_space<vmem>>, vector<1x8x1xf32>,
    return
  }
  func.func @transform_0(%arg0: i32, %arg1: i32) -> (i32, i32, i32) {
    %c0_i32 = arith.constant 0 : i32
    %c0_i32_0 = arith.constant 0 : i32
    return %arg0, %c0_i32, %arg1 : i32, i32, i32
  }
  func.func @transform_1(%arg0: i32, %arg1: i32) -> (i32, i32) {
    %c0_i32 = arith.constant 0 : i32
    %c0_i32_0 = arith.constant 0 : i32
    %c0_i32_1 = arith.constant 0 : i32
    return %c0_i32, %c0_i32_0 : i32, i32
  }
  func.func @transform_2(%arg0: i32, %arg1: i32) -> (i32, i32, i32) {
    %c0_i32 = arith.constant 0 : i32
    %c0_i32_0 = arith.constant 0 : i32
    return %arg0, %c0_i32, %arg1 : i32, i32, i32
  }
  func.func @transform_3(%arg0: i32, %arg1: i32) -> (i32, i32, i32) {
    %c0_i32 = arith.constant 0 : i32
    %c0_i32_0 = arith.constant 0 : i32
    %c0_i32_1 = arith.constant 0 : i32
    return %arg0, %c0_i32, %c0_i32_0 : i32, i32, i32
  }
  func.func @transform_4(%arg0: i32, %arg1: i32) -> (i32, i32, i32) {
    %c0_i32 = arith.constant 0 : i32
    %c0_i32_0 = arith.constant 0 : i32
    %c0_i32_1 = arith.constant 0 : i32
    return %arg0, %c0_i32, %c0_i32_0 : i32, i32, i32
  }
}

module attributes {stable_mosaic.version = 11 : i64} {
  func.func @_bn_lrelu_kernel(%arg0: i32, %arg1: i32, %arg2: memref<1x8x64xbf16, #tpu.memory_space<vmem>>, %arg3: memref<8x1xf32, #tpu.memory_space<vmem>>, %arg4: memref<8x1xf32, #tpu.memory_space<vmem>>, %arg5: memref<1x8x64xf32, #tpu.memory_space<vmem>>) attributes {dimension_semantics = [#tpu.dimension_semantics<parallel>, #tpu.dimension_semantics<parallel>], iteration_bounds = array<i64: 2, 1>, scalar_prefetch = 0 : i64, scratch_operands = 0 : i64, tpu.core_type = #tpu.core_type<tc>, window_params = [{transform_indices = @transform_0, window_bounds = array<i64: 1, 8, 64>}, {pipeline_mode = #tpu.pipeline_mode<synchronous>, transform_indices = @transform_1, window_bounds = array<i64: 8, 1>}, {pipeline_mode = #tpu.pipeline_mode<synchronous>, transform_indices = @transform_2, window_bounds = array<i64: 8, 1>}, {transform_indices = @transform_3, window_bounds = array<i64: 1, 8, 64>}]} {
    %c0 = arith.constant 0 : index
    %c0_0 = arith.constant 0 : index
    %c0_1 = arith.constant 0 : index
    %0 = vector.load %arg2[%c0, %c0_0, %c0_1] : memref<1x8x64xbf16, #tpu.memory_space<vmem>>, vector<1x8x64xbf16>
    %1 = vector.shape_cast %0 : vector<1x8x64xbf16> to vector<8x64xbf16>
    %2 = arith.extf %1 : vector<8x64xbf16> to vector<8x64xf32>
    %c0_2 = arith.constant 0 : index
    %c0_3 = arith.constant 0 : index
    %3 = vector.load %arg3[%c0_2, %c0_3] : memref<8x1xf32, #tpu.memory_space<vmem>>, vector<8x1xf32>
    %4 = vector.broadcast %3 : vector<8x1xf32> to vector<8x64xf32>
    %5 = arith.mulf %2, %4 : vector<8x64xf32>
    %c0_4 = arith.constant 0 : index
    %c0_5 = arith.constant 0 : index
    %6 = vector.load %arg4[%c0_4, %c0_5] : memref<8x1xf32, #tpu.memory_space<vmem>>, vector<8x1xf32>
    %7 = vector.broadcast %6 : vector<8x1xf32> to vector<8x64xf32>
    %8 = arith.addf %5, %7 : vector<8x64xf32>
    %cst = arith.constant 0.000000e+00 : f32
    %9 = vector.broadcast %cst : f32 to vector<8x64xf32>
    %10 = arith.cmpf oge, %8, %9 : vector<8x64xf32>
    %cst_6 = arith.constant 0.00999999977 : f32
    %11 = vector.broadcast %cst_6 : f32 to vector<8x64xf32>
    %12 = arith.mulf %11, %8 : vector<8x64xf32>
    %13 = arith.select %10, %8, %12 : vector<8x64xi1>, vector<8x64xf32>
    %c0_7 = arith.constant 0 : index
    %c0_8 = arith.constant 0 : index
    %c0_9 = arith.constant 0 : index
    %14 = vector.load %arg5[%c0_7, %c0_8, %c0_9] : memref<1x8x64xf32, #tpu.memory_space<vmem>>, vector<1x8x64xf32>
    %15 = vector.shape_cast %14 : vector<1x8x64xf32> to vector<8x64xf32>
    %16 = vector.shape_cast %13 : vector<8x64xf32> to vector<1x8x64xf32>
    tpu.vector_store %arg5[%c0_7, %c0_8, %c0_9], %16 {strides = array<i32>} : memref<1x8x64xf32, #tpu.memory_space<vmem>>, vector<1x8x64xf32>,
    return
  }
  func.func @transform_0(%arg0: i32, %arg1: i32) -> (i32, i32, i32) {
    %c0_i32 = arith.constant 0 : i32
    %c0_i32_0 = arith.constant 0 : i32
    return %arg0, %c0_i32, %arg1 : i32, i32, i32
  }
  func.func @transform_1(%arg0: i32, %arg1: i32) -> (i32, i32) {
    %c0_i32 = arith.constant 0 : i32
    %c0_i32_0 = arith.constant 0 : i32
    %c0_i32_1 = arith.constant 0 : i32
    return %c0_i32, %c0_i32_0 : i32, i32
  }
  func.func @transform_2(%arg0: i32, %arg1: i32) -> (i32, i32) {
    %c0_i32 = arith.constant 0 : i32
    %c0_i32_0 = arith.constant 0 : i32
    %c0_i32_1 = arith.constant 0 : i32
    return %c0_i32, %c0_i32_0 : i32, i32
  }
  func.func @transform_3(%arg0: i32, %arg1: i32) -> (i32, i32, i32) {
    %c0_i32 = arith.constant 0 : i32
    %c0_i32_0 = arith.constant 0 : i32
    return %arg0, %c0_i32, %arg1 : i32, i32, i32
  }
}

</mosaic_0001>

<bundles_post_ra>
// kernel: encoder_layer_forward.2
= control target key start
LH: loop header
LB: loop body
LE: loop exit
PB: predicated region body
PF: predicated region fallthrough
CT: control target
= control target key end

     0   :  { %s605_s15 = smov 0   ;;  %s607_s16 = smov 0   ;;  %s659_s0 = inlined_call_operand.vmem [shape: bf16[2,64,64], index: 0, kind: input, shape index: {}]   ;;  %s660_s1 = inlined_call_operand.vmem [shape: bf16[8,64], index: 1, kind: input, shape index: {}]   ;;  %s661_s2 = inlined_call_operand.vmem [shape: bf16[2,8,64], index: 2, kind: output, shape index: {0}]   ;;  %s662_s3 = inlined_call_operand.vmem [shape: f32[2,8,1], index: 3, kind: output, shape index: {1}]   ;;  %s663_s4 = inlined_call_operand.vmem [shape: f32[2,8,1], index: 4, kind: output, shape index: {2}]  }
   0x1   :  { %s609_s17 = smov 0  }
   0x2 LB: > { %s27_s18 = sadd.s32 1, %s572_s16  ;;  %p493_p0 = scmp.ge.s32.totalorder %s576_s17, 1  ;;  %s576_s17 = sphi %s609_s17, %s15_s17   ;;  %s572_s16 = sphi %s607_s16, %s665_s16   ;;  %s568_s15 = sphi %s605_s15, %s664_s15  }
   0x3   : > { %p29_p1 = scmp.ge.s32.totalorder %s27_s18, 2  ;;  %p186_p2 = scmp.lt.s32.totalorder %s576_s17, 3 }
   0x5   : > { %s667_s18 = smov (%p29_p1, %s27_s18), 0  ;;  %p187_p3 = pnand %p493_p0, %p186_p2 }
   0x6   : > { %p225_p4 = scmp.lt.s32.totalorder (!%p187_p3), %s568_s15, 1 }
   0x7   : > { %190 = sbr.rel (%p187_p3) target bundleno = 370 (0x172), region = 28 }
   0xc   : > { %v578_v0 = vmov 0.0   ;;  %vm579_vm0 = vmmov 0   ;;  %s669_s15 = smov (!%p225_p4, %s568_s15), 1  ;;  %v256_v5 = vld [vmem:[%s660_s1] sm:$0xf]  ;;  %vm289_vm1 = vcmask 523264  }
   0xd   : > { %512 = vmatprep.subr.bf16.mxu0 %v578_v0  ;;  %520 = vmatprep.mubr.msk.bf16.mxu0 %vm579_vm0, %v578_v0  ;;  %s506_s19 = sshll.u32 %s669_s15, 5  ;;  %s497_s25 = sshll.u32 %s669_s15, 3  ;;  %vm253_vm2 = vcmask 7168   ;;  %vm334_vm3 = vcmask 519168  }
   0xe   : > { %s232_s22 = scalar_lea.vmem %s659_s0, %s506_s19  ;;  %s243_s28 = scalar_lea.vmem %s662_s3, %s497_s25 }
   0xf   : > { %v550_v1 = vld [vmem:[%s232_s22 + $0x18] sm:$0xff]   ;;  %v551_v2 = vld [vmem:[%s232_s22 + $0x10] sm:$0xff]   ;;  %v552_v3 = vld [vmem:[%s232_s22 + $0x8] sm:$0xff]   ;;  %254 = vst.msk [vmem:[%s243_s28] sm:$0xff] %vm253_vm2, %v578_v0  ;;  %s496_s29 = sshll.u32 %s669_s15, 2  ;;  %s247_s9 = scalar_lea.vmem %s663_s4, %s497_s25 }
  0x10   : > { %513 = vmatpush3.bf16.msra.mxu0 %v550_v1  ;;  %v553_v4 = vld [vmem:[%s232_s22] sm:$0xff]   ;;  %s239_s6 = scalar_lea.vmem %s661_s2, %s496_s29  ;;  %255 = vst.msk [vmem:[%s247_s9] sm:$0xff] %vm253_vm2, %v578_v0 }
  0x11   : > { %514 = vmatprep.subr.bf16.mxu0 %v578_v0 }
  0x14   : > { %515 = vmatpush3.bf16.msra.mxu0 %v551_v2 }
  0x15   : > { %516 = vmatprep.subr.bf16.mxu0 %v578_v0 }
  0x16   : > { %v336_v14 = vld [vmem:[%s243_s28] sm:$0xff] }
  0x17   : > { %v343_v17 = vld [vmem:[%s247_s9] sm:$0xff] }
  0x18   : > { %517 = vmatpush3.bf16.msra.mxu0 %v552_v3 }
  0x19   : > { %518 = vmatprep.subr.bf16.mxu0 %v578_v0 }
  0x1c   : > { %519 = vmatpush3.bf16.msra.mxu0 %v553_v4 }
  0x1f   : > { %521 = vmatmul.mubr.msk.bf16.vlgmr.msra.gmra.mxu0 %vm289_vm1, %v256_v5 }
  0xdf   : > { %v327_v6 = vpop.f32.mrf.mxu0 }
  0xe0   : > { %v333_v7 = vpack.c.bf16 %v327_v6, %v327_v6  ;;  %v337_v8 = vsel %vm289_vm1, %v327_v6, 0.0  ;;  %v344_v9 = vmul.f32 %v327_v6, %v327_v6 }
  0xe1   : > { %338 = vadd.xlane.f32.xlu0 %v337_v8  ;;  %v522_v10 = vpop.f32.mrf.mxu0 }
  0xe2   : > { %335 = vst.msk [vmem:[%s239_s6] sm:$0xf] %vm334_vm3, %v333_v7  ;;  %v345_v12 = vsel %vm289_vm1, %v344_v9, 0.0 }
  0xe3   : > { %v330_v11 = vpop.f32.mrf.mxu0 }
  0xe5   : > { %346 = vadd.xlane.f32.xlu0 %v345_v12  ;;  %v523_v13 = vpop.f32.mrf.mxu0 }
 0x16a   : > { %v339_v15 = vpop.xlane.xlu0 %338 }
 0x16b   : > { %v340_v16 = vadd.f32 %v339_v15, %v336_v14 }
 0x16d   : > { %342 = vst.msk [vmem:[%s243_s28] sm:$0xff] %vm253_vm2, %v340_v16 }
 0x16e   : > { %v347_v18 = vpop.xlane.xlu0 %346 }
 0x16f   : > { %v348_v19 = vadd.f32 %v347_v18, %v343_v17 }
 0x171   : > { %349 = vst.msk [vmem:[%s247_s9] sm:$0xff] %vm253_vm2, %v348_v19 }
 0x172 PF: > { %s15_s17 = sadd.s32 1, %s576_s17   ;;  %s664_s15 = smov %s572_s16 }
 0x173   : > { %p12_p5 = scmp.ge.s32.totalorder %s15_s17, 4   ;;  %s665_s16 = smov %s667_s18 }
 0x175   :  { %14 = sbr.rel (!%p12_p5) target bundleno = 2 (0x2), region = 86 }

// kernel: encoder_layer_forward.3
= control target key start
LH: loop header
LB: loop body
LE: loop exit
PB: predicated region body
PF: predicated region fallthrough
CT: control target
= control target key end

     0   :  { %s372_s12 = smov 0   ;;  %s374_s13 = smov 0   ;;  %s411_s0 = inlined_call_operand.vmem [shape: bf16[2,8,64], index: 0, kind: input, shape index: {}]   ;;  %s412_s1 = inlined_call_operand.vmem [shape: f32[8,1], index: 1, kind: input, shape index: {}]   ;;  %s413_s2 = inlined_call_operand.vmem [shape: f32[8,1], index: 2, kind: input, shape index: {}]   ;;  %s414_s3 = inlined_call_operand.vmem [shape: f32[2,8,64], index: 3, kind: output, shape index: {}]  }
   0x1   :  { %s376_s14 = smov 0  }
   0x2 LB: > { %s25_s15 = sadd.s32 1, %s345_s13  ;;  %p296_p0 = scmp.ge.s32.totalorder %s349_s14, 1  ;;  %s349_s14 = sphi %s376_s14, %s13_s14   ;;  %s345_s13 = sphi %s374_s13, %s416_s13   ;;  %s341_s12 = sphi %s372_s12, %s415_s12  }
   0x3   : > { %p27_p1 = scmp.ge.s32.totalorder %s25_s15, 2  ;;  %p155_p2 = scmp.lt.s32.totalorder %s349_s14, 3 }
   0x5   : > { %s418_s15 = smov (%p27_p1, %s25_s15), 0  ;;  %p156_p3 = pnand %p296_p0, %p155_p2 }
   0x6   : > { %p183_p4 = scmp.lt.s32.totalorder (!%p156_p3), %s341_s12, 1 }
   0x7   : > { %159 = sbr.rel (%p156_p3) target bundleno = 148 (0x94), region = 32 }
   0xc   : > { %v199_v0 = vld [vmem:[%s412_s1] sm:$0xff]  ;;  %v351_v1 = vmov 0   ;;  %s420_s12 = smov (!%p183_p4, %s341_s12), 1  ;;  %vm216_vm0 = vcmask 523264  }
   0xd   : > { %326 = vset.pattern.permute.xlu0 %v351_v1  ;;  %v206_v2 = vld [vmem:[%s413_s2] sm:$0xff]  ;;  %s297_s20 = sshll.u32 %s420_s12, 2  ;;  %s298_s24 = sshll.u32 %s420_s12, 3 }
   0xe   : > { %202 = vperm.xlu0 %326, %v199_v0   ;;  %s189_s23 = scalar_lea.vmem %s411_s0, %s297_s20  ;;  %s196_s27 = scalar_lea.vmem %s414_s3, %s298_s24 }
   0xf   : > { %v197_v3 = vld [vmem:[%s189_s23] sm:$0xf] }
  0x10   : > { %v198_v4 = vunpack.c.l.bf16 %v197_v3 }
  0x12   : > { %209 = vperm.xlu0 %326, %v206_v2  }
  0x89   : > { %v203_v5 = vpop.permute.xlu0 %202 }
  0x8a   : > { %v205_v6 = vmul.f32 %v203_v5, %v198_v4 }
  0x8d   : > { %v210_v7 = vpop.permute.xlu0 %209 }
  0x8e   : > { %v212_v8 = vadd.f32 %v210_v7, %v205_v6 }
  0x90   : > { %vm213_vm1 = vcmp.ge.f32.partialorder %v212_v8, 0.0  ;;  %v214_v9 = vmul.f32 0.01, %v212_v8 }
  0x92   : > { %v215_v10 = vsel %vm213_vm1, %v212_v8, %v214_v9 }
  0x93   : > { %217 = vst.msk [vmem:[%s196_s27] sm:$0xff] %vm216_vm0, %v215_v10 }
  0x94 PF: > { %s13_s14 = sadd.s32 1, %s349_s14   ;;  %s415_s12 = smov %s345_s13 }
  0x95   : > { %p10_p5 = scmp.ge.s32.totalorder %s13_s14, 4   ;;  %s416_s13 = smov %s418_s15 }
  0x97   :  { %12 = sbr.rel (!%p10_p5) target bundleno = 2 (0x2), region = 62 }

</bundles_post_ra>
